<compile_context>
chip_gen: v5e
topology: v5e:2x2
jax: 0.10.0
libtpu: 0.0.40
codegen_flags: <defaults>
</compile_context>

<pallas_src>
import jax
import jax.numpy as jnp
from jax.experimental import pallas as pl
from jax.experimental.pallas import tpu as pltpu


def _round_up(n, m):
    return ((n + m - 1) // m) * m


def mlp_kernel(x_ref, w1_ref, b1_ref, w2_ref, b2_ref,
               w3_ref, b3_ref, w4_ref, b4_ref, o_ref):
    x = x_ref[...]                                              # (1, TB)  f32

    # Layer 1: (64,1) x (1,TB) outer product + bias on the VPU (K=1 -> skip MXU).
    h = jnp.maximum(w1_ref[...] * x + b1_ref[...], 0.0)        # (64, TB) f32

    # Layer 2: (64,64) @ (64,TB) on the MXU, bf16 operands, f32 accumulation.
    h = jnp.dot(w2_ref[...], h.astype(jnp.bfloat16),
                preferred_element_type=jnp.float32) + b2_ref[...]
    h = jnp.maximum(h, 0.0)                                     # (64, TB) f32

    # Layer 3: same shape as layer 2.
    h = jnp.dot(w3_ref[...], h.astype(jnp.bfloat16),
                preferred_element_type=jnp.float32) + b3_ref[...]
    h = jnp.maximum(h, 0.0)                                     # (64, TB) f32

    # Layer 4: (1,64) @ (64,TB) -> lane-dense (1,TB) result (no activation).
    out = jnp.dot(w4_ref[...], h.astype(jnp.bfloat16),
                  preferred_element_type=jnp.float32) + b4_ref[...]
    o_ref[...] = out.astype(o_ref.dtype)                        # (1, TB)


def mlp_forward(x, params, tb=2048):
    """x: (B, 1) float32. params: PyTorch-oriented (out, in) weights, (out, 1) biases."""
    B = x.shape[0]
    # 128-aligned batch tile; small batches collapse to a single tile.
    TB = min(tb, _round_up(max(B, 1), 128))
    Bp = _round_up(B, TB)

    # Transpose so batch is on the lane axis, pad to a whole number of tiles.
    xT = jnp.pad(x.astype(jnp.float32).T, ((0, 0), (0, Bp - B)))    # (1, Bp)

    # bf16 copies of the MXU-facing weights (f32 accumulation in-kernel).
    w2 = params["w2"].astype(jnp.bfloat16)
    w3 = params["w3"].astype(jnp.bfloat16)
    w4 = params["w4"].astype(jnp.bfloat16)

    grid = (Bp // TB,)

    in_specs = [
        pl.BlockSpec((1, TB), lambda i: (0, i)),      # xT   : streamed per tile
        pl.BlockSpec((64, 1), lambda i: (0, 0)),      # w1   : resident
        pl.BlockSpec((64, 1), lambda i: (0, 0)),      # b1   : resident
        pl.BlockSpec((64, 64), lambda i: (0, 0)),     # w2   : resident (bf16)
        pl.BlockSpec((64, 1), lambda i: (0, 0)),      # b2   : resident
        pl.BlockSpec((64, 64), lambda i: (0, 0)),     # w3   : resident (bf16)
        pl.BlockSpec((64, 1), lambda i: (0, 0)),      # b3   : resident
        pl.BlockSpec((1, 64), lambda i: (0, 0)),      # w4   : resident (bf16)
        pl.BlockSpec((1, 1), lambda i: (0, 0)),       # b4   : resident
    ]
    out_specs = pl.BlockSpec((1, TB), lambda i: (0, i))

    outT = pl.pallas_call(
        mlp_kernel,
        out_shape=jax.ShapeDtypeStruct((1, Bp), jnp.float32),
        grid=grid,
        in_specs=in_specs,
        out_specs=out_specs,
        compiler_params=pltpu.CompilerParams(
            dimension_semantics=("parallel",)),
    )(xT, params["w1"], params["b1"], w2, params["b2"],
      w3, params["b3"], w4, params["b4"])

    return outT[0, :B].reshape(B, 1)


def init_params(key):
    """Deterministic init matching nn.Linear: W is (out, in), bias stored as (out, 1)."""
    dims = [(1, 64), (64, 64), (64, 64), (64, 1)]   # (in, out) per layer
    params = {}
    for i, (fin, fout) in enumerate(dims, start=1):
        key, kw, kb = jax.random.split(key, 3)
        bound = 1.0 / jnp.sqrt(jnp.float32(fin))
        params[f"w{i}"] = jax.random.uniform(kw, (fout, fin), jnp.float32, -bound, bound)
        params[f"b{i}"] = jax.random.uniform(kb, (fout, 1), jnp.float32, -bound, bound)
    return params


def _reference_f32(x, p):
    """Plain f32 reference matching the PyTorch forward."""
    h = jnp.maximum(x @ p["w1"].T + p["b1"].T, 0.0)
    h = jnp.maximum(h @ p["w2"].T + p["b2"].T, 0.0)
    h = jnp.maximum(h @ p["w3"].T + p["b3"].T, 0.0)
    return h @ p["w4"].T + p["b4"].T


def _reference_bf16(x, p):
    """Reference applying the same bf16 operand casts the kernel uses."""
    h = jnp.maximum(p["w1"] * x.T + p["b1"], 0.0)
    h = jnp.maximum(jnp.dot(p["w2"].astype(jnp.bfloat16), h.astype(jnp.bfloat16),
                            preferred_element_type=jnp.float32) + p["b2"], 0.0)
    h = jnp.maximum(jnp.dot(p["w3"].astype(jnp.bfloat16), h.astype(jnp.bfloat16),
                            preferred_element_type=jnp.float32) + p["b3"], 0.0)
    out = jnp.dot(p["w4"].astype(jnp.bfloat16), h.astype(jnp.bfloat16),
                  preferred_element_type=jnp.float32) + p["b4"]
    return out.T                                                 # (B, 1)


if __name__ == "__main__":
    key = jax.random.PRNGKey(0)
    kx, kp = jax.random.split(key)

    B = 8
    x = jax.random.normal(kx, (B, 1), dtype=jnp.float32)
    params = init_params(kp)

    out = mlp_forward(x, params)
    out = jax.block_until_ready(out)
    assert out.shape == (B, 1)

    # Tight check against a reference using the identical bf16 operand casts.
    ref_bf16 = _reference_bf16(x, params)
    assert jnp.allclose(out, ref_bf16, atol=1e-4, rtol=1e-4), "mismatch vs bf16-matched ref"

    # Looser check against the pure-f32 PyTorch-equivalent forward.
    ref_f32 = _reference_f32(x, params)
    assert jnp.allclose(out, ref_f32, atol=5e-2, rtol=5e-2), "mismatch vs f32 ref"

    print("KERNEL_OK")
</pallas_src>

<mosaic_0001>
module attributes {stable_mosaic.version = 11 : i64} {
  func.func @mlp_kernel(%arg0: i32, %arg1: memref<1x128xf32, #tpu.memory_space<vmem>>, %arg2: memref<64x1xf32, #tpu.memory_space<vmem>>, %arg3: memref<64x1xf32, #tpu.memory_space<vmem>>, %arg4: memref<64x64xbf16, #tpu.memory_space<vmem>>, %arg5: memref<64x1xf32, #tpu.memory_space<vmem>>, %arg6: memref<64x64xbf16, #tpu.memory_space<vmem>>, %arg7: memref<64x1xf32, #tpu.memory_space<vmem>>, %arg8: memref<1x64xbf16, #tpu.memory_space<vmem>>, %arg9: memref<1x1xf32, #tpu.memory_space<vmem>>, %arg10: memref<1x128xf32, #tpu.memory_space<vmem>>) attributes {dimension_semantics = [#tpu.dimension_semantics<parallel>], iteration_bounds = array<i64: 1>, scalar_prefetch = 0 : i64, scratch_operands = 0 : i64, tpu.core_type = #tpu.core_type<tc>, window_params = [{transform_indices = @transform_0, window_bounds = array<i64: 1, 128>}, {pipeline_mode = #tpu.pipeline_mode<synchronous>, transform_indices = @transform_1, window_bounds = array<i64: 64, 1>}, {pipeline_mode = #tpu.pipeline_mode<synchronous>, transform_indices = @transform_2, window_bounds = array<i64: 64, 1>}, {pipeline_mode = #tpu.pipeline_mode<synchronous>, transform_indices = @transform_3, window_bounds = array<i64: 64, 64>}, {pipeline_mode = #tpu.pipeline_mode<synchronous>, transform_indices = @transform_4, window_bounds = array<i64: 64, 1>}, {pipeline_mode = #tpu.pipeline_mode<synchronous>, transform_indices = @transform_5, window_bounds = array<i64: 64, 64>}, {pipeline_mode = #tpu.pipeline_mode<synchronous>, transform_indices = @transform_6, window_bounds = array<i64: 64, 1>}, {pipeline_mode = #tpu.pipeline_mode<synchronous>, transform_indices = @transform_7, window_bounds = array<i64: 1, 64>}, {pipeline_mode = #tpu.pipeline_mode<synchronous>, transform_indices = @transform_8, window_bounds = array<i64: 1, 1>}, {transform_indices = @transform_9, window_bounds = array<i64: 1, 128>}]} {
    %c0 = arith.constant 0 : index
    %c0_0 = arith.constant 0 : index
    %0 = vector.load %arg1[%c0, %c0_0] : memref<1x128xf32, #tpu.memory_space<vmem>>, vector<1x128xf32>
    %c0_1 = arith.constant 0 : index
    %c0_2 = arith.constant 0 : index
    %1 = vector.load %arg2[%c0_1, %c0_2] : memref<64x1xf32, #tpu.memory_space<vmem>>, vector<64x1xf32>
    %2 = vector.broadcast %1 : vector<64x1xf32> to vector<64x128xf32>
    %3 = vector.broadcast %0 : vector<1x128xf32> to vector<64x128xf32>
    %4 = arith.mulf %2, %3 : vector<64x128xf32>
    %c0_3 = arith.constant 0 : index
    %c0_4 = arith.constant 0 : index
    %5 = vector.load %arg3[%c0_3, %c0_4] : memref<64x1xf32, #tpu.memory_space<vmem>>, vector<64x1xf32>
    %6 = vector.broadcast %5 : vector<64x1xf32> to vector<64x128xf32>
    %7 = arith.addf %4, %6 : vector<64x128xf32>
    %cst = arith.constant 0.000000e+00 : f32
    %8 = vector.broadcast %cst : f32 to vector<64x128xf32>
    %9 = arith.maximumf %7, %8 : vector<64x128xf32>
    %c0_5 = arith.constant 0 : index
    %c0_6 = arith.constant 0 : index
    %10 = vector.load %arg4[%c0_5, %c0_6] : memref<64x64xbf16, #tpu.memory_space<vmem>>, vector<64x64xbf16>
    %11 = arith.truncf %9 : vector<64x128xf32> to vector<64x128xbf16>
    %cst_7 = arith.constant dense<0.000000e+00> : vector<64x128xf32>
    %12 = tpu.matmul %10, %11, %cst_7 {dimension_numbers = #tpu.dot_dimension_numbers<[1], [0], [0], [1], [0, 0, 1, 1], [], []>} : vector<64x64xbf16>, vector<64x128xbf16>, vector<64x128xf32> -> vector<64x128xf32>
    %c0_8 = arith.constant 0 : index
    %c0_9 = arith.constant 0 : index
    %13 = vector.load %arg5[%c0_8, %c0_9] : memref<64x1xf32, #tpu.memory_space<vmem>>, vector<64x1xf32>
    %14 = vector.broadcast %13 : vector<64x1xf32> to vector<64x128xf32>
    %15 = arith.addf %12, %14 : vector<64x128xf32>
    %cst_10 = arith.constant 0.000000e+00 : f32
    %16 = vector.broadcast %cst_10 : f32 to vector<64x128xf32>
    %17 = arith.maximumf %15, %16 : vector<64x128xf32>
    %c0_11 = arith.constant 0 : index
    %c0_12 = arith.constant 0 : index
    %18 = vector.load %arg6[%c0_11, %c0_12] : memref<64x64xbf16, #tpu.memory_space<vmem>>, vector<64x64xbf16>
    %19 = arith.truncf %17 : vector<64x128xf32> to vector<64x128xbf16>
    %cst_13 = arith.constant dense<0.000000e+00> : vector<64x128xf32>
    %20 = tpu.matmul %18, %19, %cst_13 {dimension_numbers = #tpu.dot_dimension_numbers<[1], [0], [0], [1], [0, 0, 1, 1], [], []>} : vector<64x64xbf16>, vector<64x128xbf16>, vector<64x128xf32> -> vector<64x128xf32>
    %c0_14 = arith.constant 0 : index
    %c0_15 = arith.constant 0 : index
    %21 = vector.load %arg7[%c0_14, %c0_15] : memref<64x1xf32, #tpu.memory_space<vmem>>, vector<64x1xf32>
    %22 = vector.broadcast %21 : vector<64x1xf32> to vector<64x128xf32>
    %23 = arith.addf %20, %22 : vector<64x128xf32>
    %cst_16 = arith.constant 0.000000e+00 : f32
    %24 = vector.broadcast %cst_16 : f32 to vector<64x128xf32>
    %25 = arith.maximumf %23, %24 : vector<64x128xf32>
    %c0_17 = arith.constant 0 : index
    %c0_18 = arith.constant 0 : index
    %26 = vector.load %arg8[%c0_17, %c0_18] : memref<1x64xbf16, #tpu.memory_space<vmem>>, vector<1x64xbf16>
    %27 = arith.truncf %25 : vector<64x128xf32> to vector<64x128xbf16>
    %cst_19 = arith.constant dense<0.000000e+00> : vector<1x128xf32>
    %28 = tpu.matmul %26, %27, %cst_19 {dimension_numbers = #tpu.dot_dimension_numbers<[1], [0], [0], [1], [0, 0, 1, 1], [], []>} : vector<1x64xbf16>, vector<64x128xbf16>, vector<1x128xf32> -> vector<1x128xf32>
    %c0_20 = arith.constant 0 : index
    %c0_21 = arith.constant 0 : index
    %29 = vector.load %arg9[%c0_20, %c0_21] : memref<1x1xf32, #tpu.memory_space<vmem>>, vector<1x1xf32>
    %30 = vector.broadcast %29 : vector<1x1xf32> to vector<1x128xf32>
    %31 = arith.addf %28, %30 : vector<1x128xf32>
    %c0_22 = arith.constant 0 : index
    %c0_23 = arith.constant 0 : index
    %32 = vector.load %arg10[%c0_22, %c0_23] : memref<1x128xf32, #tpu.memory_space<vmem>>, vector<1x128xf32>
    tpu.vector_store %arg10[%c0_22, %c0_23], %31 {strides = array<i32>} : memref<1x128xf32, #tpu.memory_space<vmem>>, vector<1x128xf32>,
    return
  }
  func.func @transform_0(%arg0: i32) -> (i32, i32) {
    %c0_i32 = arith.constant 0 : i32
    %c0_i32_0 = arith.constant 0 : i32
    return %c0_i32, %arg0 : i32, i32
  }
  func.func @transform_1(%arg0: i32) -> (i32, i32) {
    %c0_i32 = arith.constant 0 : i32
    %c0_i32_0 = arith.constant 0 : i32
    %c0_i32_1 = arith.constant 0 : i32
    return %c0_i32, %c0_i32_0 : i32, i32
  }
  func.func @transform_2(%arg0: i32) -> (i32, i32) {
    %c0_i32 = arith.constant 0 : i32
    %c0_i32_0 = arith.constant 0 : i32
    %c0_i32_1 = arith.constant 0 : i32
    return %c0_i32, %c0_i32_0 : i32, i32
  }
  func.func @transform_3(%arg0: i32) -> (i32, i32) {
    %c0_i32 = arith.constant 0 : i32
    %c0_i32_0 = arith.constant 0 : i32
    %c0_i32_1 = arith.constant 0 : i32
    return %c0_i32, %c0_i32_0 : i32, i32
  }
  func.func @transform_4(%arg0: i32) -> (i32, i32) {
    %c0_i32 = arith.constant 0 : i32
    %c0_i32_0 = arith.constant 0 : i32
    %c0_i32_1 = arith.constant 0 : i32
    return %c0_i32, %c0_i32_0 : i32, i32
  }
  func.func @transform_5(%arg0: i32) -> (i32, i32) {
    %c0_i32 = arith.constant 0 : i32
    %c0_i32_0 = arith.constant 0 : i32
    %c0_i32_1 = arith.constant 0 : i32
    return %c0_i32, %c0_i32_0 : i32, i32
  }
  func.func @transform_6(%arg0: i32) -> (i32, i32) {
    %c0_i32 = arith.constant 0 : i32
    %c0_i32_0 = arith.constant 0 : i32
    %c0_i32_1 = arith.constant 0 : i32
    return %c0_i32, %c0_i32_0 : i32, i32
  }
  func.func @transform_7(%arg0: i32) -> (i32, i32) {
    %c0_i32 = arith.constant 0 : i32
    %c0_i32_0 = arith.constant 0 : i32
    %c0_i32_1 = arith.constant 0 : i32
    return %c0_i32, %c0_i32_0 : i32, i32
  }
  func.func @transform_8(%arg0: i32) -> (i32, i32) {
    %c0_i32 = arith.constant 0 : i32
    %c0_i32_0 = arith.constant 0 : i32
    %c0_i32_1 = arith.constant 0 : i32
    return %c0_i32, %c0_i32_0 : i32, i32
  }
  func.func @transform_9(%arg0: i32) -> (i32, i32) {
    %c0_i32 = arith.constant 0 : i32
    %c0_i32_0 = arith.constant 0 : i32
    return %c0_i32, %arg0 : i32, i32
  }
}

</mosaic_0001>

<bundles_post_ra>
// kernel: tpu_custom_call.1
= control target key start
LH: loop header
LB: loop body
LE: loop exit
PB: predicated region body
PF: predicated region fallthrough
CT: control target
= control target key end

     0   :  { %s746_s0 = inlined_call_operand.vmem [shape: f32[1,128], index: 0, kind: input, shape index: {}]   ;;  %s747_s1 = inlined_call_operand.vmem [shape: f32[64,1], index: 1, kind: input, shape index: {}]   ;;  %s748_s2 = inlined_call_operand.vmem [shape: f32[64,1], index: 2, kind: input, shape index: {}]   ;;  %s749_s3 = inlined_call_operand.vmem [shape: bf16[64,64], index: 3, kind: input, shape index: {}]   ;;  %s750_s4 = inlined_call_operand.vmem [shape: f32[64,1], index: 4, kind: input, shape index: {}]   ;;  %s751_s5 = inlined_call_operand.vmem [shape: bf16[64,64], index: 5, kind: input, shape index: {}]   ;;  %s752_s6 = inlined_call_operand.vmem [shape: f32[64,1], index: 6, kind: input, shape index: {}]   ;;  %s753_s7 = inlined_call_operand.vmem [shape: bf16[1,64], index: 7, kind: input, shape index: {}]   ;;  %s754_s8 = inlined_call_operand.<no memory space> [shape: f32[1,1], index: 8, kind: input, shape index: {}]   ;;  %s755_s9 = inlined_call_operand.hbm [shape: f32[1,128], index: 9, kind: output, shape index: {}]  }
   0x1   :  { %v14_v0 = vstv %s754_s8 }
   0x2   :  { %15 = vst [vmem:[#allocation2] sm:$0x1] %v14_v0 }
   0x3   :  { %v102_v1 = vld [vmem:[%s748_s2 + $0x30] sm:$0xff]  ;;  %v41_v3 = vld [vmem:[%s747_s1 + $0x20] sm:$0xff]  ;;  %v553_v4 = vmov 0  }
   0x4   :  { %v43_v2 = vld [vmem:[%s747_s1 + $0x30] sm:$0xff]  ;;  %525 = vset.pattern.permute.xlu2 %v553_v4  ;;  %524 = vset.pattern.permute.xlu1 %v553_v4 }
   0x5   :  { %523 = vset.pattern.permute.xlu0 %v553_v4  ;;  %136 = vperm.xlu1 %524, %v102_v1  }
   0x6   :  { %77 = vperm.xlu0 %523, %v43_v2   ;;  %67 = vperm.xlu2 %525, %v41_v3  }
   0x7   :  { %16 = vsyncpa [#allocation4], 0  ;;  %v103_v5 = vld [vmem:[%s748_s2 + $0x38] sm:$0xff]  ;;  %v42_v7 = vld [vmem:[%s747_s1 + $0x28] sm:$0xff]  ;;  %vm240_vm0 = vcmask 523264   ;;  %s455_s22 = sshll.u32 %s755_s9, 4  ;;  %s456_s22 = int_to_ptr.hbm [resolvable:$true] %s455_s22 }
   0x8   :  { %v44_v6 = vld [vmem:[%s747_s1 + $0x38] sm:$0xff]  ;;  %v101_v8 = vld [vmem:[%s748_s2 + $0x28] sm:$0xff]  ;;  %v100_v9 = vld [vmem:[%s748_s2 + $0x20] sm:$0xff] }
   0x9   :  { %v39_v10 = vld [vmem:[%s747_s1 + $0x10] sm:$0xff]  ;;  %v40_v12 = vld [vmem:[%s747_s1 + $0x18] sm:$0xff]  ;;  %v38_v14 = vld [vmem:[%s747_s1 + $0x8] sm:$0xff] }
   0xa   :  { %v98_v11 = vld [vmem:[%s748_s2 + $0x10] sm:$0xff]  ;;  %v99_v13 = vld [vmem:[%s748_s2 + $0x18] sm:$0xff]  ;;  %v96_v15 = vld [vmem:[%s748_s2] sm:$0xff] }
   0xb   :  { %v37_v16 = vld [vmem:[%s747_s1] sm:$0xff]  ;;  %v178_v17 = vld [vmem:[%s750_s4 + $0x30] sm:$0xff]  ;;  %v179_v18 = vld [vmem:[%s750_s4 + $0x38] sm:$0xff] }
   0xc   :  { %v97_v19 = vld [vmem:[%s748_s2 + $0x8] sm:$0xff]  ;;  %v174_v21 = vld [vmem:[%s750_s4 + $0x10] sm:$0xff]  ;;  %v176_v22 = vld [vmem:[%s750_s4 + $0x20] sm:$0xff] }
   0xd   :  { %141 = vperm.xlu1 %524, %v103_v5   ;;  %v177_v20 = vld [vmem:[%s750_s4 + $0x28] sm:$0xff]  ;;  %v172_v23 = vld [vmem:[%s750_s4] sm:$0xff]  ;;  %v175_v25 = vld [vmem:[%s750_s4 + $0x18] sm:$0xff] }
   0xe   :  { %82 = vperm.xlu0 %523, %v44_v6   ;;  %72 = vperm.xlu2 %525, %v42_v7   ;;  %v173_v24 = vld [vmem:[%s750_s4 + $0x8] sm:$0xff]  ;;  %v309_v26 = vld [vmem:[%s752_s6 + $0x38] sm:$0xff]  ;;  %v306_v27 = vld [vmem:[%s752_s6 + $0x20] sm:$0xff]  ;;  %s554_s4 = smov [#allocation3]  }
   0xf   :  { %v308_v28 = vld [vmem:[%s752_s6 + $0x30] sm:$0xff]  ;;  %v305_v30 = vld [vmem:[%s752_s6 + $0x18] sm:$0xff]  ;;  %v307_v31 = vld [vmem:[%s752_s6 + $0x28] sm:$0xff]  ;;  %s453_s19 = sshll.u32 %s554_s4, 4  ;;  %s454_s19 = int_to_ptr.vmem [resolvable:$true] %s453_s19 }
  0x10   :  { %v304_v29 = vld [vmem:[%s752_s6 + $0x10] sm:$0xff]  ;;  %v303_v32 = vld [vmem:[%s752_s6 + $0x8] sm:$0xff]  ;;  %v424_v33 = vld [vmem:[#allocation2] sm:$0x1] }
  0x11   :  { %v302_v34 = vld [vmem:[%s752_s6] sm:$0xff] }
  0x12   :  { %v526_v38 = vld [vmem:[%s746_s0] ss:$0 sm:$0xff] }
  0x15   :  { %131 = vperm.xlu1 %524, %v101_v8  }
  0x16   :  { %126 = vperm.xlu0 %523, %v100_v9   ;;  %57 = vperm.xlu2 %525, %v39_v10  }
  0x1d   :  { %116 = vperm.xlu1 %524, %v98_v11  }
  0x1e   :  { %62 = vperm.xlu0 %523, %v40_v12   ;;  %121 = vperm.xlu2 %525, %v99_v13  }
  0x25   :  { %52 = vperm.xlu1 %524, %v38_v14  }
  0x26   :  { %106 = vperm.xlu2 %525, %v96_v15   ;;  %47 = vperm.xlu0 %523, %v37_v16   ;;  %v505_v16 = vld [vmem:[%s749_s3] sm:$0xff] }
  0x2d   :  { %212 = vperm.xlu1 %524, %v178_v17   ;;  %v506_v17 = vld [vmem:[%s749_s3 + $0x8] sm:$0xff] }
  0x2e   :  { %217 = vperm.xlu2 %525, %v179_v18   ;;  %111 = vperm.xlu0 %523, %v97_v19   ;;  %v507_v18 = vld [vmem:[%s749_s3 + $0x10] sm:$0xff]  ;;  %v508_v19 = vld [vmem:[%s749_s3 + $0x18] sm:$0xff] }
  0x35   :  { %207 = vperm.xlu1 %524, %v177_v20  }
  0x36   :  { %192 = vperm.xlu2 %525, %v174_v21   ;;  %202 = vperm.xlu0 %523, %v176_v22  }
  0x3d   :  { %182 = vperm.xlu1 %524, %v172_v23  }
  0x3e   :  { %187 = vperm.xlu2 %525, %v173_v24   ;;  %197 = vperm.xlu0 %523, %v175_v25  }
  0x45   :  { %347 = vperm.xlu1 %524, %v309_v26  }
  0x46   :  { %332 = vperm.xlu2 %525, %v306_v27   ;;  %342 = vperm.xlu0 %523, %v308_v28  }
  0x4d   :  { %322 = vperm.xlu1 %524, %v304_v29  }
  0x4e   :  { %327 = vperm.xlu2 %525, %v305_v30   ;;  %337 = vperm.xlu0 %523, %v307_v31  }
  0x55   :  { %317 = vperm.xlu1 %524, %v303_v32  }
  0x56   :  { %427 = vperm.xlu2 %525, %v424_v33   ;;  %312 = vperm.xlu0 %523, %v302_v34  }
  0x60   :  { %v68_v35 = vpop.permute.xlu2 %67 }
  0x61   :  { %v92_v49 = vmul.f32 %v526_v38, %v68_v35 }
  0x68   :  { %v73_v40 = vpop.permute.xlu2 %72 }
  0x69   :  { %v93_v48 = vmul.f32 %v526_v38, %v73_v40 }
  0x70   :  { %v58_v52 = vpop.permute.xlu2 %57 }
  0x71   :  { %v90_v59 = vmul.f32 %v526_v38, %v58_v52 }
  0x77   :  { %v137_v36 = vpop.permute.xlu1 %136 }
  0x78   :  { %v78_v37 = vpop.permute.xlu0 %77  ;;  %v122_v0 = vpop.permute.xlu2 %121 }
  0x79   :  { %v94_v39 = vmul.f32 %v526_v38, %v78_v37 }
  0x7b   :  { %v150_v43 = vadd.f32 %v137_v36, %v94_v39 }
  0x7d   :  { %v158_v46 = vmax.f32 %v150_v43, 0.0 }
  0x7f   :  { %v142_v41 = vpop.permute.xlu1 %141 }
  0x80   :  { %v83_v42 = vpop.permute.xlu0 %82  ;;  %v107_v8 = vpop.permute.xlu2 %106 }
  0x81   :  { %v95_v44 = vmul.f32 %v526_v38, %v83_v42 }
  0x83   :  { %v151_v45 = vadd.f32 %v142_v41, %v95_v44 }
  0x85   :  { %v159_v47 = vmax.f32 %v151_v45, 0.0 }
  0x87   :  { %v132_v50 = vpop.permute.xlu1 %131  ;;  %v171_v51 = vpack.c.bf16 %v159_v47, %v158_v46 }
  0x88   :  { %v149_v53 = vadd.f32 %v132_v50, %v93_v48  ;;  %v127_v54 = vpop.permute.xlu0 %126  ;;  %v218_v24 = vpop.permute.xlu2 %217 }
  0x89   :  { %v148_v55 = vadd.f32 %v127_v54, %v92_v49  ;;  %257 = vmatpush.bf16.msra.mxu0 %v171_v51  ;;  %513 = vmatpush.bf16.msra.mxu3 %v171_v51 }
  0x8a   :  { %v157_v56 = vmax.f32 %v149_v53, 0.0 }
  0x8b   :  { %v156_v57 = vmax.f32 %v148_v55, 0.0 }
  0x8d   :  { %v170_v58 = vpack.c.bf16 %v157_v56, %v156_v57  ;;  %v509_v56 = vld [vmem:[%s751_s5] sm:$0xff]  ;;  %v510_v57 = vld [vmem:[%s751_s5 + $0x8] sm:$0xff] }
  0x8f   :  { %258 = vmatpush.bf16.msra.mxu0 %v170_v58  ;;  %514 = vmatpush.bf16.msra.mxu3 %v170_v58  ;;  %v117_v60 = vpop.permute.xlu1 %116  ;;  %v511_v58 = vld [vmem:[%s751_s5 + $0x10] sm:$0xff] }
  0x90   :  { %v63_v61 = vpop.permute.xlu0 %62  ;;  %v146_v62 = vadd.f32 %v117_v60, %v90_v59  ;;  %v193_v29 = vpop.permute.xlu2 %192  ;;  %v512_v59 = vld [vmem:[%s751_s5 + $0x18] sm:$0xff] }
  0x91   :  { %v91_v63 = vmul.f32 %v526_v38, %v63_v61 }
  0x92   :  { %v154_v2 = vmax.f32 %v146_v62, 0.0 }
  0x93   :  { %v147_v1 = vadd.f32 %v122_v0, %v91_v63 }
  0x95   :  { %v155_v3 = vmax.f32 %v147_v1, 0.0 }
  0x97   :  { %v169_v4 = vpack.c.bf16 %v155_v3, %v154_v2  ;;  %v53_v7 = vpop.permute.xlu1 %52 }
  0x98   :  { %v48_v5 = vpop.permute.xlu0 %47  ;;  %v89_v9 = vmul.f32 %v526_v38, %v53_v7  ;;  %v188_v45 = vpop.permute.xlu2 %187 }
  0x99   :  { %259 = vmatpush.bf16.msra.mxu0 %v169_v4  ;;  %515 = vmatpush.bf16.msra.mxu3 %v169_v4  ;;  %v88_v6 = vmul.f32 %v526_v38, %v48_v5 }
  0x9b   :  { %v144_v10 = vadd.f32 %v107_v8, %v88_v6 }
  0x9d   :  { %v152_v13 = vmax.f32 %v144_v10, 0.0 }
  0x9f   :  { %v213_v25 = vpop.permute.xlu1 %212 }
  0xa0   :  { %v112_v11 = vpop.permute.xlu0 %111  ;;  %v333_v3 = vpop.permute.xlu2 %332 }
  0xa1   :  { %v145_v12 = vadd.f32 %v112_v11, %v89_v9 }
  0xa3   :  { %v153_v14 = vmax.f32 %v145_v12, 0.0 }
  0xa5   :  { %v168_v15 = vpack.c.bf16 %v153_v14, %v152_v13 }
  0xa7   :  { %260 = vmatpush.bf16.msra.mxu0 %v168_v15  ;;  %516 = vmatpush.bf16.msra.mxu3 %v168_v15  ;;  %v208_v31 = vpop.permute.xlu1 %207 }
  0xa8   :  { %v203_v27 = vpop.permute.xlu0 %202  ;;  %v328_v14 = vpop.permute.xlu2 %327 }
  0xaa   :  { %480 = vmatmul.msk.bf16.vlgmr.msra.gmra.mxu0 %vm240_vm0, %v505_v16  ;;  %481 = vmatmul.msk.bf16.vlgmr.msra.gmra.mxu3 %vm240_vm0, %v506_v17 }
  0xaf   :  { %v183_v49 = vpop.permute.xlu1 %182 }
  0xb0   :  { %v198_v38 = vpop.permute.xlu0 %197 }
  0xb7   :  { %v348_v0 = vpop.permute.xlu1 %347 }
  0xb8   :  { %v343_v1 = vpop.permute.xlu0 %342 }
  0xba   :  { %482 = vmatmul.msk.bf16.gmra.mxu3 %vm240_vm0, %v507_v18 }
  0xbf   :  { %v323_v5 = vpop.permute.xlu1 %322 }
  0xc0   :  { %v338_v7 = vpop.permute.xlu0 %337 }
  0xca   :  { %483 = vmatmul.msk.bf16.gmra.mxu3 %vm240_vm0, %v508_v19 }
 0x127   :  { %v262_v28 = vpop.f32.mrf.mxu0 }
 0x128   :  { %v263_v50 = vadd.f32 %v262_v28, %v183_v49 }
 0x12a   :  { %v282_v54 = vmax.f32 %v263_v50, 0.0 }
 0x12d   :  { %v267_v20 = vpop.f32.mrf.mxu3 }
 0x12e   :  { %v268_v43 = vadd.f32 %v267_v20, %v193_v29 }
 0x12f   :  { %v264_v42 = vpop.f32.mrf.mxu0 }
 0x130   :  { %v265_v46 = vadd.f32 %v264_v42, %v188_v45  ;;  %v284_v51 = vmax.f32 %v268_v43, 0.0 }
 0x132   :  { %v283_v52 = vmax.f32 %v265_v46, 0.0 }
 0x134   :  { %v298_v55 = vpack.c.bf16 %v283_v52, %v282_v54 }
 0x135   :  { %v269_v21 = vpop.f32.mrf.mxu3 }
 0x136   :  { %v270_v39 = vadd.f32 %v269_v21, %v198_v38  ;;  %v318_v21 = vpop.permute.xlu1 %317 }
 0x138   :  { %v285_v47 = vmax.f32 %v270_v39, 0.0 }
 0x13a   :  { %v299_v53 = vpack.c.bf16 %v285_v47, %v284_v51 }
 0x13d   :  { %v272_v22 = vpop.f32.mrf.mxu3 }
 0x13e   :  { %v273_v35 = vadd.f32 %v272_v22, %v203_v27 }
 0x140   :  { %v286_v44 = vmax.f32 %v273_v35, 0.0 }
 0x145   :  { %v274_v23 = vpop.f32.mrf.mxu3 }
 0x146   :  { %v275_v33 = vadd.f32 %v274_v23, %v208_v31 }
 0x148   :  { %v287_v40 = vmax.f32 %v275_v33, 0.0  ;;  %v428_v33 = vpop.permute.xlu2 %427 }
 0x14a   :  { %v300_v48 = vpack.c.bf16 %v287_v40, %v286_v44 }
 0x14d   :  { %v277_v26 = vpop.f32.mrf.mxu3 }
 0x14e   :  { %v278_v30 = vadd.f32 %v277_v26, %v213_v25  ;;  %v313_v25 = vpop.permute.xlu0 %312 }
 0x150   :  { %v288_v36 = vmax.f32 %v278_v30, 0.0 }
 0x155   :  { %v279_v32 = vpop.f32.mrf.mxu3 }
 0x156   :  { %v280_v34 = vadd.f32 %v279_v32, %v218_v24  ;;  %v419_v32 = vld [vmem:[%s753_s7] sm:$0x1] }
 0x158   :  { %v289_v37 = vmax.f32 %v280_v34, 0.0  ;;  %v430_v34 = vperm.slane %v428_v33, 0 }
 0x15a   :  { %v301_v41 = vpack.c.bf16 %v289_v37, %v288_v36 }
 0x15c   :  { %386 = vmatpush.bf16.msrb.mxu0 %v301_v41  ;;  %517 = vmatpush.bf16.msra.mxu1 %v301_v41 }
 0x160   :  { %387 = vmatpush.bf16.msrb.mxu0 %v300_v48  ;;  %518 = vmatpush.bf16.msra.mxu1 %v300_v48 }
 0x164   :  { %388 = vmatpush.bf16.msrb.mxu0 %v299_v53  ;;  %519 = vmatpush.bf16.msra.mxu1 %v299_v53 }
 0x168   :  { %389 = vmatpush.bf16.msrb.mxu0 %v298_v55  ;;  %520 = vmatpush.bf16.msra.mxu1 %v298_v55 }
 0x16b   :  { %500 = vmatmul.msk.bf16.vlgmr.msrb.gmra.mxu0 %vm240_vm0, %v509_v56  ;;  %501 = vmatmul.msk.bf16.vlgmr.msra.gmra.mxu1 %vm240_vm0, %v510_v57 }
 0x17b   :  { %502 = vmatmul.msk.bf16.gmra.mxu1 %vm240_vm0, %v511_v58 }
 0x18b   :  { %503 = vmatmul.msk.bf16.gmra.mxu1 %vm240_vm0, %v512_v59 }
 0x1e8   :  { %v396_v60 = vpop.f32.mrf.mxu1  ;;  %v391_v4 = vpop.f32.mrf.mxu0 }
 0x1e9   :  { %v397_v19 = vadd.f32 %v396_v60, %v323_v5  ;;  %v392_v26 = vadd.f32 %v391_v4, %v313_v25 }
 0x1eb   :  { %v413_v27 = vmax.f32 %v397_v19, 0.0  ;;  %v411_v30 = vmax.f32 %v392_v26, 0.0 }
 0x1f0   :  { %v398_v61 = vpop.f32.mrf.mxu1  ;;  %v393_v18 = vpop.f32.mrf.mxu0 }
 0x1f1   :  { %v399_v15 = vadd.f32 %v398_v61, %v328_v14  ;;  %v394_v22 = vadd.f32 %v393_v18, %v318_v21 }
 0x1f3   :  { %v414_v23 = vmax.f32 %v399_v15, 0.0  ;;  %v412_v28 = vmax.f32 %v394_v22, 0.0 }
 0x1f5   :  { %v421_v29 = vpack.c.bf16 %v414_v23, %v413_v27  ;;  %v420_v31 = vpack.c.bf16 %v412_v28, %v411_v30 }
 0x1f8   :  { %v401_v62 = vpop.f32.mrf.mxu1 }
 0x1f9   :  { %v402_v11 = vadd.f32 %v401_v62, %v333_v3 }
 0x1fb   :  { %v415_v20 = vmax.f32 %v402_v11, 0.0 }
 0x200   :  { %v403_v63 = vpop.f32.mrf.mxu1 }
 0x201   :  { %v404_v9 = vadd.f32 %v403_v63, %v338_v7 }
 0x203   :  { %v416_v16 = vmax.f32 %v404_v9, 0.0 }
 0x205   :  { %v422_v24 = vpack.c.bf16 %v416_v16, %v415_v20 }
 0x208   :  { %v406_v2 = vpop.f32.mrf.mxu1 }
 0x209   :  { %v407_v6 = vadd.f32 %v406_v2, %v343_v1 }
 0x20b   :  { %v417_v12 = vmax.f32 %v407_v6, 0.0 }
 0x210   :  { %v408_v8 = vpop.f32.mrf.mxu1 }
 0x211   :  { %v409_v10 = vadd.f32 %v408_v8, %v348_v0 }
 0x213   :  { %v418_v13 = vmax.f32 %v409_v10, 0.0 }
 0x215   :  { %v423_v17 = vpack.c.bf16 %v418_v13, %v417_v12 }
 0x217   :  { %438 = vmatpush.bf16.msra.mxu2 %v423_v17 }
 0x21b   :  { %439 = vmatpush.bf16.msra.mxu2 %v422_v24 }
 0x21f   :  { %440 = vmatpush.bf16.msra.mxu2 %v421_v29 }
 0x223   :  { %441 = vmatpush.bf16.msra.mxu2 %v420_v31 }
 0x226   :  { %504 = vmatmul.msk.bf16.vlgmr.msra.gmra.mxu2 %vm240_vm0, %v419_v32 }
 0x2a9   :  { %v443_v35 = vpop.f32.mrf.mxu2 }
 0x2aa   :  { %v444_v36 = vadd.f32 %v443_v35, %v430_v34 }
 0x2ac   :  { %447 = vst [vmem:[#allocation3] sm:$0x1] %v444_v36 }
 0x2ad   :  { %458 = dma.vmem_to_hbm [thread:$0]  %s454_s19, 16, %s456_s22, [#allocation4]  }
 0x2b1   :  { %v445_v37 = vpop.f32.mrf.mxu2 }
 0x2b2   :  { %551 = dma.done.wait [#allocation4], 16  }
 0x2b3   :  { %552 = vsyncadd [#allocation4], 4294967280 }
 0x2b4   :  { %463 = vsyncpa [#allocation4], 1 }

</bundles_post_ra>
